<compile_context>
chip_gen: v6e
topology: v6e:2x2x1
jax: 0.10.0
libtpu: 0.0.40
codegen_flags: <defaults>
</compile_context>

<pallas_src>
import functools

import jax
import jax.numpy as jnp
from jax.experimental import pallas as pl
from jax.experimental.pallas import tpu as pltpu


# Per-step VMEM spent on the double-buffered input+output blocks. A few MiB
# already reaches ~85% of HBM roofline; keeping blocks small buys pipeline
# depth (more grid steps) instead of bigger transfers.
_BLOCK_VMEM_BUDGET = 6 * 1024 * 1024
# Largest single-plane (P=1) footprint we run through the Pallas path; beyond
# this fall back to XLA's pad (no H-tiling fallback in-kernel yet).
_SINGLE_PLANE_VMEM_CAP = 24 * 1024 * 1024
# Safe on every generation: v7x (64 MiB physical) defaults to 32 MiB scoped,
# v5e/v6e have 128 MiB physical.
_VMEM_LIMIT_BYTES = 32 * 1024 * 1024
# Aim for at least this many grid steps so each of v7x's two TensorCores gets
# several steps of DMA/compute overlap.
_MIN_GRID_STEPS = 8


def _pad_kernel_fused(x_ref, o_ref, *, pad: int):
    """Zero-pad a block of P planes: (P, H, W) -> (P, H+2p, W+2p).

    Builds the whole padded tile in registers and writes it with ONE
    lane-dense, offset-0, full-block store.
    """
    P, H, W = x_ref.shape
    _, Hp, Wp = o_ref.shape
    dt = o_ref.dtype
    x = x_ref[...]
    # Lane padding (left / right) on the value side -> full-width row band.
    zl = jnp.zeros((P, H, pad), dt)
    zr = jnp.zeros((P, H, pad), dt)
    band = jnp.concatenate([zl, x, zr], axis=2)            # (P, H, Wp)
    # Sublane padding (top / bottom) -> full output block, stored once.
    zt = jnp.zeros((P, pad, Wp), dt)
    zb = jnp.zeros((P, pad, Wp), dt)
    o_ref[...] = jnp.concatenate([zt, band, zb], axis=1)   # (P, Hp, Wp)


def _pad_kernel_sliced(x_ref, o_ref, *, pad: int):
    """Fallback kernel (known-good lowering): every element written exactly
    once via four zero border strips + one interior copy."""
    P, H, W = x_ref.shape
    _, Hp, Wp = o_ref.shape
    dt = o_ref.dtype
    o_ref[:, :pad, :] = jnp.zeros((P, pad, Wp), dt)
    o_ref[:, pad + H:, :] = jnp.zeros((P, pad, Wp), dt)
    o_ref[:, pad:pad + H, :pad] = jnp.zeros((P, H, pad), dt)
    o_ref[:, pad:pad + H, pad + W:] = jnp.zeros((P, H, pad), dt)
    o_ref[:, pad:pad + H, pad:pad + W] = x_ref[...]


def _choose_plane_block(nc: int, h: int, w: int, hp: int, wp: int,
                        itemsize: int):
    """Pick planes-per-step P and the number of grid steps.

    P fits the VMEM budget with double-buffered in+out blocks and keeps at
    least ~_MIN_GRID_STEPS steps for pipelining / megacore balance. P does NOT
    need to divide nc: the grid uses cdiv and the last block may be ragged.
    """
    per_plane = 2 * (h * w + hp * wp) * itemsize   # double-buffered in + out
    p_fit = max(1, _BLOCK_VMEM_BUDGET // per_plane)
    p_steps = max(1, nc // _MIN_GRID_STEPS)
    p = int(max(1, min(nc, p_fit, p_steps)))
    steps = int(pl.cdiv(nc, p))
    # Re-balance so the ragged last block is as full as the others.
    p = int(pl.cdiv(nc, steps))
    return p, steps


def _run_pallas_pad(kernel_body, x_planes, pad_size, P, steps, H, W, Hp, Wp):
    NC = x_planes.shape[0]
    itemsize = x_planes.dtype.itemsize
    kernel = functools.partial(kernel_body, pad=pad_size)
    return pl.pallas_call(
        kernel,
        out_shape=jax.ShapeDtypeStruct((NC, Hp, Wp), x_planes.dtype),
        grid_spec=pltpu.PrefetchScalarGridSpec(
            num_scalar_prefetch=0,
            grid=(steps,),
            in_specs=[
                # Last two block dims equal the full array dims, so the (8,128)
                # divisibility constraint does not apply.
                pl.BlockSpec((P, H, W), lambda i: (i, 0, 0)),
            ],
            out_specs=pl.BlockSpec((P, Hp, Wp), lambda i: (i, 0, 0)),
        ),
        compiler_params=pltpu.CompilerParams(
            dimension_semantics=("parallel",),
            vmem_limit_bytes=_VMEM_LIMIT_BYTES,
        ),
        cost_estimate=pl.CostEstimate(
            flops=0,
            transcendentals=0,
            bytes_accessed=int((H * W + Hp * Wp) * NC * itemsize),
        ),
    )(x_planes)


def constant_pad2d(x: jax.Array, pad_size: int) -> jax.Array:
    """Equivalent of nn.ConstantPad2d(pad_size, 0) on an NCHW tensor."""
    if pad_size == 0:
        return x
    N, C, H, W = x.shape
    Hp, Wp = H + 2 * pad_size, W + 2 * pad_size
    NC = N * C
    itemsize = x.dtype.itemsize

    # Robustness: a single plane that does not fit the VMEM window is padded
    # by XLA directly instead of failing to compile (earliest on v7x's 64 MiB).
    # TODO(synk): replace with an H-tiled / DMA-only (HBM->HBM interior copy)
    # Pallas variant for very large planes.
    if 2 * (H * W + Hp * Wp) * itemsize > _SINGLE_PLANE_VMEM_CAP:
        return jnp.pad(x, ((0, 0), (0, 0),
                           (pad_size, pad_size), (pad_size, pad_size)))

    # Collapse batch/channel into one "plane" axis (free reshape for NCHW).
    x_planes = x.reshape(NC, H, W)
    P, steps = _choose_plane_block(NC, H, W, Hp, Wp, itemsize)

    try:
        out_planes = _run_pallas_pad(
            _pad_kernel_fused, x_planes, pad_size, P, steps, H, W, Hp, Wp)
    except Exception:
        # Unaligned in-register concatenate not supported on this Mosaic
        # build -> known-good sliced-store kernel (same write-once semantics).
        out_planes = _run_pallas_pad(
            _pad_kernel_sliced, x_planes, pad_size, P, steps, H, W, Hp, Wp)

    return out_planes.reshape(N, C, Hp, Wp)


class PadderLayer:
    """JAX/Pallas port of padder_layer (no parameters)."""

    def __init__(self, pad_size: int):
        self.pad_size = pad_size

    def __call__(self, x: jax.Array) -> jax.Array:
        return constant_pad2d(x, self.pad_size)


if __name__ == "__main__":
    key = jax.random.PRNGKey(0)
    N, C, H, W = 2, 4, 16, 16
    pad_size = 2

    x = jax.random.normal(key, (N, C, H, W), dtype=jnp.float32)

    layer = PadderLayer(pad_size)
    out = layer(x)
    out = jax.block_until_ready(out)

    # Reference check against jnp.pad (same semantics as ConstantPad2d(value=0)).
    ref = jnp.pad(x, ((0, 0), (0, 0),
                      (pad_size, pad_size), (pad_size, pad_size)))
    assert out.shape == (N, C, H + 2 * pad_size, W + 2 * pad_size)
    assert out.dtype == x.dtype
    assert jnp.array_equal(out, ref)

    print("KERNEL_OK")
</pallas_src>

<mosaic_0001>
module attributes {stable_mosaic.version = 11 : i64} {
  func.func @_pad_kernel_fused(%arg0: i32, %arg1: memref<1x16x16xf32, #tpu.memory_space<vmem>>, %arg2: memref<1x20x20xf32, #tpu.memory_space<vmem>>) attributes {dimension_semantics = [#tpu.dimension_semantics<parallel>], iteration_bounds = array<i64: 8>, scalar_prefetch = 0 : i64, scratch_operands = 0 : i64, tpu.core_type = #tpu.core_type<tc>, window_params = [{transform_indices = @transform_0, window_bounds = array<i64: 1, 16, 16>}, {transform_indices = @transform_1, window_bounds = array<i64: 1, 20, 20>}]} {
    %c0 = arith.constant 0 : index
    %c0_0 = arith.constant 0 : index
    %c0_1 = arith.constant 0 : index
    %0 = vector.load %arg1[%c0, %c0_0, %c0_1] : memref<1x16x16xf32, #tpu.memory_space<vmem>>, vector<1x16x16xf32>
    %cst = arith.constant 0.000000e+00 : f32
    %1 = vector.broadcast %cst : f32 to vector<1x16x2xf32>
    %cst_2 = arith.constant 0.000000e+00 : f32
    %2 = vector.broadcast %cst_2 : f32 to vector<1x16x2xf32>
    %3 = tpu.concatenate %1, %0, %2 in 2 : vector<1x16x2xf32>, vector<1x16x16xf32>, vector<1x16x2xf32> -> vector<1x16x20xf32>
    %cst_3 = arith.constant 0.000000e+00 : f32
    %4 = vector.broadcast %cst_3 : f32 to vector<1x2x20xf32>
    %cst_4 = arith.constant 0.000000e+00 : f32
    %5 = vector.broadcast %cst_4 : f32 to vector<1x2x20xf32>
    %6 = tpu.concatenate %4, %3, %5 in 1 : vector<1x2x20xf32>, vector<1x16x20xf32>, vector<1x2x20xf32> -> vector<1x20x20xf32>
    %c0_5 = arith.constant 0 : index
    %c0_6 = arith.constant 0 : index
    %c0_7 = arith.constant 0 : index
    %7 = vector.load %arg2[%c0_5, %c0_6, %c0_7] : memref<1x20x20xf32, #tpu.memory_space<vmem>>, vector<1x20x20xf32>
    tpu.vector_store %arg2[%c0_5, %c0_6, %c0_7], %6 {strides = array<i32>} : memref<1x20x20xf32, #tpu.memory_space<vmem>>, vector<1x20x20xf32>,
    return
  }
  func.func @transform_0(%arg0: i32) -> (i32, i32, i32) {
    %c0_i32 = arith.constant 0 : i32
    %c0_i32_0 = arith.constant 0 : i32
    %c0_i32_1 = arith.constant 0 : i32
    return %arg0, %c0_i32, %c0_i32_0 : i32, i32, i32
  }
  func.func @transform_1(%arg0: i32) -> (i32, i32, i32) {
    %c0_i32 = arith.constant 0 : i32
    %c0_i32_0 = arith.constant 0 : i32
    %c0_i32_1 = arith.constant 0 : i32
    return %arg0, %c0_i32, %c0_i32_0 : i32, i32, i32
  }
}

module attributes {stable_mosaic.version = 11 : i64} {
  func.func @_pad_kernel_sliced(%arg0: i32, %arg1: memref<1x16x16xf32, #tpu.memory_space<vmem>>, %arg2: memref<1x20x20xf32, #tpu.memory_space<vmem>>) attributes {dimension_semantics = [#tpu.dimension_semantics<parallel>], iteration_bounds = array<i64: 8>, scalar_prefetch = 0 : i64, scratch_operands = 0 : i64, tpu.core_type = #tpu.core_type<tc>, window_params = [{transform_indices = @transform_0, window_bounds = array<i64: 1, 16, 16>}, {transform_indices = @transform_1, window_bounds = array<i64: 1, 20, 20>}]} {
    %cst = arith.constant 0.000000e+00 : f32
    %0 = vector.broadcast %cst : f32 to vector<1x2x20xf32>
    %c0 = arith.constant 0 : index
    %c0_0 = arith.constant 0 : index
    %c0_1 = arith.constant 0 : index
    %1 = vector.load %arg2[%c0, %c0_0, %c0_1] : memref<1x20x20xf32, #tpu.memory_space<vmem>>, vector<1x2x20xf32>
    tpu.vector_store %arg2[%c0, %c0_0, %c0_1], %0 {strides = array<i32>} : memref<1x20x20xf32, #tpu.memory_space<vmem>>, vector<1x2x20xf32>,
    %cst_2 = arith.constant 0.000000e+00 : f32
    %2 = vector.broadcast %cst_2 : f32 to vector<1x2x20xf32>
    %c0_3 = arith.constant 0 : index
    %c18 = arith.constant 18 : index
    %c0_4 = arith.constant 0 : index
    %3 = vector.load %arg2[%c0_3, %c18, %c0_4] : memref<1x20x20xf32, #tpu.memory_space<vmem>>, vector<1x2x20xf32>
    tpu.vector_store %arg2[%c0_3, %c18, %c0_4], %2 {strides = array<i32>} : memref<1x20x20xf32, #tpu.memory_space<vmem>>, vector<1x2x20xf32>,
    %cst_5 = arith.constant 0.000000e+00 : f32
    %4 = vector.broadcast %cst_5 : f32 to vector<1x16x2xf32>
    %c0_6 = arith.constant 0 : index
    %c2 = arith.constant 2 : index
    %c0_7 = arith.constant 0 : index
    %5 = vector.load %arg2[%c0_6, %c2, %c0_7] : memref<1x20x20xf32, #tpu.memory_space<vmem>>, vector<1x16x2xf32>
    tpu.vector_store %arg2[%c0_6, %c2, %c0_7], %4 {strides = array<i32>} : memref<1x20x20xf32, #tpu.memory_space<vmem>>, vector<1x16x2xf32>,
    %cst_8 = arith.constant 0.000000e+00 : f32
    %6 = vector.broadcast %cst_8 : f32 to vector<1x16x2xf32>
    %c0_9 = arith.constant 0 : index
    %c2_10 = arith.constant 2 : index
    %c18_11 = arith.constant 18 : index
    %7 = vector.load %arg2[%c0_9, %c2_10, %c18_11] : memref<1x20x20xf32, #tpu.memory_space<vmem>>, vector<1x16x2xf32>
    tpu.vector_store %arg2[%c0_9, %c2_10, %c18_11], %6 {strides = array<i32>} : memref<1x20x20xf32, #tpu.memory_space<vmem>>, vector<1x16x2xf32>,
    %c0_12 = arith.constant 0 : index
    %c0_13 = arith.constant 0 : index
    %c0_14 = arith.constant 0 : index
    %8 = vector.load %arg1[%c0_12, %c0_13, %c0_14] : memref<1x16x16xf32, #tpu.memory_space<vmem>>, vector<1x16x16xf32>
    %c0_15 = arith.constant 0 : index
    %c2_16 = arith.constant 2 : index
    %c2_17 = arith.constant 2 : index
    %9 = vector.load %arg2[%c0_15, %c2_16, %c2_17] : memref<1x20x20xf32, #tpu.memory_space<vmem>>, vector<1x16x16xf32>
    tpu.vector_store %arg2[%c0_15, %c2_16, %c2_17], %8 {strides = array<i32>} : memref<1x20x20xf32, #tpu.memory_space<vmem>>, vector<1x16x16xf32>,
    return
  }
  func.func @transform_0(%arg0: i32) -> (i32, i32, i32) {
    %c0_i32 = arith.constant 0 : i32
    %c0_i32_0 = arith.constant 0 : i32
    %c0_i32_1 = arith.constant 0 : i32
    return %arg0, %c0_i32, %c0_i32_0 : i32, i32, i32
  }
  func.func @transform_1(%arg0: i32) -> (i32, i32, i32) {
    %c0_i32 = arith.constant 0 : i32
    %c0_i32_0 = arith.constant 0 : i32
    %c0_i32_1 = arith.constant 0 : i32
    return %arg0, %c0_i32, %c0_i32_0 : i32, i32, i32
  }
}

</mosaic_0001>

<bundles_post_ra>
// kernel: tpu_custom_call.1
= control target key start
LH: loop header
LB: loop body
LE: loop exit
PB: predicated region body
PF: predicated region fallthrough
CT: control target
= control target key end

     0   :  { %6 = vsyncpa [#allocation3], 0  ;;  %s470_s0 = inlined_call_operand.hbm [shape: f32[8,16,16], index: 0, kind: input, shape index: {}]   ;;  %s471_s1 = inlined_call_operand.vmem [shape: f32[8,20,20], index: 1, kind: output, shape index: {}]  }
   0x1   :  { %8 = vsyncpa [#allocation3 + $0x1], 0  ;;  %s369_s6 = smov 0   ;;  %s371_s7 = smov 0  }
   0x2   :  { %s373_s8 = smov 0   ;;  %s375_s9 = smov 0  }
   0x3 LB: > { %s388_s10 = sadd.s32 4294967295, %s353_s9   ;;  %s391_s11 = sadd.s32 1, %s353_s9   ;;  %s353_s9 = sphi %s375_s9, %s480_s9   ;;  %s349_s8 = sphi %s373_s8, %s479_s8   ;;  %s345_s7 = sphi %s371_s7, %s478_s7   ;;  %s341_s6 = sphi %s369_s6, %s477_s6  }
   0x4   : > { %s18_s12 = ssub.s32 %s353_s9, %s391_s11  ;;  %s21_s13 = sadd.s32 1, %s349_s8 }
   0x5   : > { %p19_p0 = scmp.eq.s32.totalorder %s18_s12, 0  ;;  %p28_p1 = scmp.ne.s32.totalorder %s349_s8, %s345_s7 }
   0x6   : > { %p29_p2 = scmp.eq.s32.totalorder %s353_s9, 0  ;;  %p34_p3 = scmp.ne.s32.totalorder %s345_s7, %s341_s6 }
   0x7   : > { %s401_s14 = scalar_select %p19_p0, %s349_s8, %s21_s13  }
   0x8   : > { %p30_p4 = por %p29_p2, %p28_p1  ;;  %p35_p5 = scmp.eq.s32.totalorder %s388_s10, 0 }
   0x9   : > { %p255_p6 = scmp.lt.s32.totalorder %s353_s9, 8  ;;  %s84_s16 = sand.u32 1, %s349_s8  }
   0xa   : > { %p405_p7 = por %p35_p5, %p34_p3  ;;  %s239_s17 = sshll.u32 %s84_s16, 4 }
   0xb   : > { %s247_s18 = sshll.u32 %s353_s9, 8  ;;  %s88_s22 = scalar_lea.vmem [#allocation2], %s239_s17 }
   0xc   : > { %s473_s15 = scalar_select %p405_p7, 1, 0 }
   0xd   : > { %s414_s21 = scalar_lea.hbm %s470_s0, %s247_s18  ;;  %s95_s23 = sshll.u32 %s88_s22, 4  ;;  %s416_s23 = int_to_ptr.vmem [resolvable:$true] %s95_s23 }
   0xe   : > { %p418_p8 = pnand %p255_p6, %p30_p4  ;;  %s423_s25 = scalar_lea.sflag [#allocation3], %s84_s16 }
   0xf   : > { %s291_s26 = scalar_lea.hbm %s414_s21, 256  ;;  %s296_s29 = scalar_lea.hbm %s470_s0, 2048 }
  0x10   : > { %p292_p10 = scmp.ne.s32.totalorder %s414_s21, %s291_s26  ;;  %p293_p11 = pneg %p418_p8 }
  0x11   : > { %p297_p0 = scmp.lt.s32.totalorder %s414_s21, %s470_s0  ;;  %p298_p1 = scmp.lt.s32.totalorder %s296_s29, %s291_s26 }
  0x12   : > { %p294_p12 = pnand %p293_p11, %p292_p10 }
  0x13   : > { %p299_p2 = por %p298_p1, %p297_p0 }
  0x14   : > { %p295_p13 = pneg %p294_p12 }
  0x16   : > { %p300_p3 = pnand %p299_p2, %p295_p13 }
  0x18   : > { %303 = shalt.err (!%p300_p3)
}
  0x19   : > { %s304_s3 = scalar_lea.vmem %s416_s23, 256  ;;  %s355_s4 = smov [#allocation2]  }
  0x1a   : > { %p305_p4 = scmp.ne.s32.totalorder %s416_s23, %s304_s3  ;;  %s309_s5 = sshll.u32 %s355_s4, 4  ;;  %s310_s5 = int_to_ptr.vmem [resolvable:$false] %s309_s5 }
  0x1b   : > { %s311_s6 = scalar_lea.vmem %s310_s5, 512  ;;  %p312_p10 = scmp.lt.s32.totalorder %s416_s23, %s310_s5 }
  0x1c   : > { %p307_p5 = pnand %p305_p4, %p293_p11  ;;  %p313_p12 = scmp.lt.s32.totalorder %s311_s6, %s304_s3 }
  0x1e   : > { %p308_p6 = pneg %p307_p5  ;;  %p314_p9 = por %p313_p12, %p312_p10 }
  0x20   : > { %p315_p7 = pnand %p314_p9, %p308_p6 }
  0x22   : > { %318 = shalt.err (!%p315_p7)
}
  0x23   : > { %s356_s12 = smov 128   ;;  %s357_s13 = smov 8  }
  0x24   : > { %254 = dma.hbm_to_vmem [thread:$0]  (!%p418_p8), %s414_s21, 256, %s416_s23, %s423_s25, %s356_s12, %s356_s12, %s357_s13  }
  0x25   : > { %p103_p11 = scmp.lt.s32.totalorder %s353_s9, 9  ;;  %p475_p13 = scmp.ge.s32.totalorder %s353_s9, 1 }
  0x27   : > { %p104_p0 = pnand %p475_p13, %p103_p11 }
  0x28   : > { %s109_s16 = sand.u32 (!%p104_p0), 1, %s345_s7   ;;  %p476_p7 = scmp.ne.s32.totalorder (!%p104_p0), %s473_s15, 0 }
  0x29   : > { %107 = sbr.rel (%p104_p0) target bundleno = 174 (0xae), region = 24  ;;  %s243_s17 = sshll.u32 (!%p104_p0), %s109_s16, 4 }
  0x2a   : > { %s110_s18 = scalar_lea.sflag (!%p104_p0), [#allocation3], %s109_s16  ;;  %s113_s19 = scalar_lea.vmem (!%p104_p0), [#allocation2], %s243_s17 }
  0x2e   : > { %336 = dma.done.wait (%p476_p7), %s110_s18, 256  }
  0x2f   : > { %338 = vsyncadd (%p476_p7), %s110_s18, 4294967040  ;;  %v137_v0 = vld [vmem:[%s113_s19] sm:$0xff]  ;;  %s358_s20 = smov 2   ;;  %v138_v1 = vld [vmem:[%s113_s19 + $0x8] sm:$0xff]  ;;  %p132_p8 = scmp.lt.s32.totalorder %s388_s10, 7  ;;  %vm147_vm0 = vcmask 15360  }
  0x30   : > { %141 = vrot.lane.b32.xlu0 %v137_v0, %s358_s20  ;;  %vm150_vm1 = vcmask 146432   ;;  %vm155_vm2 = vcmask 1041408   ;;  %vm164_vm3 = vcmask 162816   ;;  %vm167_vm4 = vcmask 158720  }
  0x31   : > { %s482_s10 = smov (!%p132_p8, %s388_s10), 7 }
  0x32   : > { %s248_s9 = smul.u32 24, %s482_s10 }
  0x34   : > { %143 = vrot.lane.b32.xlu0 %v138_v1, %s358_s20  ;;  %s136_s15 = scalar_lea.vmem %s471_s1, %s248_s9 }
  0xa2   : > { %v142_v2 = vpop.permute.xlu0 %141 }
  0xa3   : > { %v148_v3 = vsel %vm147_vm0, 0.0, %v142_v2 }
  0xa4   : > { %v151_v4 = vsel %vm150_vm1, %v148_v3, 0.0 }
  0xa5   : > { %v156_v5 = vrot.slane %v151_v4, 6 }
  0xa6   : > { %v144_v6 = vpop.permute.xlu0 %143 }
  0xa7   : > { %v162_v7 = vsel %vm155_vm2, 0.0, %v156_v5  ;;  %v149_v8 = vsel %vm147_vm0, 0.0, %v144_v6 }
  0xa8   : > { %165 = vst.msk [vmem:[%s136_s15] sm:$0xff] %vm164_vm3, %v162_v7  ;;  %v152_v9 = vsel %vm150_vm1, %v149_v8, 0.0 }
  0xa9   : > { %v157_v10 = vrot.slane %v152_v9, 6 }
  0xab   : > { %v158_v11 = vsel %vm155_vm2, %v156_v5, %v157_v10  ;;  %v163_v12 = vsel %vm155_vm2, %v157_v10, 0.0 }
  0xac   : > { %166 = vst.msk [vmem:[%s136_s15 + $0x8] sm:$0xff] %vm164_vm3, %v158_v11 }
  0xad   : > { %168 = vst.msk [vmem:[%s136_s15 + $0x10] sm:$0xf] %vm167_vm4, %v163_v12 }
  0xae PF: > { %p11_p9 = scmp.ge.s32.totalorder %s391_s11, 10   ;;  %s477_s6 = smov %s345_s7 }
  0xaf   : > { %s478_s7 = smov %s349_s8  ;;  %s479_s8 = smov %s401_s14 }
  0xb0   : > { %s480_s9 = smov %s391_s11  ;;  %13 = sbr.rel (!%p11_p9) target bundleno = 3 (0x3), region = 64 }
  0xb5   :  { %190 = vsyncpa [#allocation3], 1 }
  0xb6   :  { %192 = vsyncpa [#allocation3 + $0x1], 1 }

// kernel: tpu_custom_call.1
= control target key start
LH: loop header
LB: loop body
LE: loop exit
PB: predicated region body
PF: predicated region fallthrough
CT: control target
= control target key end

     0   :  { %6 = vsyncpa [#allocation3], 0  ;;  %s462_s0 = inlined_call_operand.hbm [shape: f32[8,16,16], index: 0, kind: input, shape index: {}]   ;;  %s463_s1 = inlined_call_operand.vmem [shape: f32[8,20,20], index: 1, kind: output, shape index: {}]  }
   0x1   :  { %8 = vsyncpa [#allocation3 + $0x1], 0  ;;  %s361_s6 = smov 0   ;;  %s363_s7 = smov 0  }
   0x2   :  { %s365_s8 = smov 0   ;;  %s367_s9 = smov 0  }
   0x3 LB: > { %s380_s10 = sadd.s32 4294967295, %s344_s9   ;;  %s383_s11 = sadd.s32 1, %s344_s9   ;;  %s344_s9 = sphi %s367_s9, %s472_s9   ;;  %s340_s8 = sphi %s365_s8, %s471_s8   ;;  %s336_s7 = sphi %s363_s7, %s470_s7   ;;  %s332_s6 = sphi %s361_s6, %s469_s6  }
   0x4   : > { %s18_s12 = ssub.s32 %s344_s9, %s383_s11  ;;  %s21_s13 = sadd.s32 1, %s340_s8 }
   0x5   : > { %p19_p0 = scmp.eq.s32.totalorder %s18_s12, 0  ;;  %p28_p1 = scmp.ne.s32.totalorder %s340_s8, %s336_s7 }
   0x6   : > { %p29_p2 = scmp.eq.s32.totalorder %s344_s9, 0  ;;  %p34_p3 = scmp.ne.s32.totalorder %s336_s7, %s332_s6 }
   0x7   : > { %s393_s14 = scalar_select %p19_p0, %s340_s8, %s21_s13  }
   0x8   : > { %p30_p4 = por %p29_p2, %p28_p1  ;;  %p35_p5 = scmp.eq.s32.totalorder %s380_s10, 0 }
   0x9   : > { %p245_p6 = scmp.lt.s32.totalorder %s344_s9, 8  ;;  %s84_s16 = sand.u32 1, %s340_s8  }
   0xa   : > { %p397_p7 = por %p35_p5, %p34_p3  ;;  %s229_s17 = sshll.u32 %s84_s16, 4 }
   0xb   : > { %s237_s18 = sshll.u32 %s344_s9, 8  ;;  %s88_s22 = scalar_lea.vmem [#allocation2], %s229_s17 }
   0xc   : > { %s465_s15 = scalar_select %p397_p7, 1, 0 }
   0xd   : > { %s406_s21 = scalar_lea.hbm %s462_s0, %s237_s18  ;;  %s95_s23 = sshll.u32 %s88_s22, 4  ;;  %s408_s23 = int_to_ptr.vmem [resolvable:$true] %s95_s23 }
   0xe   : > { %p410_p8 = pnand %p245_p6, %p30_p4  ;;  %s415_s25 = scalar_lea.sflag [#allocation3], %s84_s16 }
   0xf   : > { %s282_s26 = scalar_lea.hbm %s406_s21, 256  ;;  %s287_s29 = scalar_lea.hbm %s462_s0, 2048 }
  0x10   : > { %p283_p10 = scmp.ne.s32.totalorder %s406_s21, %s282_s26  ;;  %p284_p11 = pneg %p410_p8 }
  0x11   : > { %p288_p0 = scmp.lt.s32.totalorder %s406_s21, %s462_s0  ;;  %p289_p1 = scmp.lt.s32.totalorder %s287_s29, %s282_s26 }
  0x12   : > { %p285_p12 = pnand %p284_p11, %p283_p10 }
  0x13   : > { %p290_p2 = por %p289_p1, %p288_p0 }
  0x14   : > { %p286_p13 = pneg %p285_p12 }
  0x16   : > { %p291_p3 = pnand %p290_p2, %p286_p13 }
  0x18   : > { %294 = shalt.err (!%p291_p3)
}
  0x19   : > { %s295_s3 = scalar_lea.vmem %s408_s23, 256  ;;  %s346_s4 = smov [#allocation2]  }
  0x1a   : > { %p296_p4 = scmp.ne.s32.totalorder %s408_s23, %s295_s3  ;;  %s300_s5 = sshll.u32 %s346_s4, 4  ;;  %s301_s5 = int_to_ptr.vmem [resolvable:$false] %s300_s5 }
  0x1b   : > { %s302_s6 = scalar_lea.vmem %s301_s5, 512  ;;  %p303_p10 = scmp.lt.s32.totalorder %s408_s23, %s301_s5 }
  0x1c   : > { %p298_p5 = pnand %p296_p4, %p284_p11  ;;  %p304_p12 = scmp.lt.s32.totalorder %s302_s6, %s295_s3 }
  0x1e   : > { %p299_p6 = pneg %p298_p5  ;;  %p305_p9 = por %p304_p12, %p303_p10 }
  0x20   : > { %p306_p7 = pnand %p305_p9, %p299_p6 }
  0x22   : > { %309 = shalt.err (!%p306_p7)
}
  0x23   : > { %s347_s12 = smov 128   ;;  %s348_s13 = smov 8  }
  0x24   : > { %244 = dma.hbm_to_vmem [thread:$0]  (!%p410_p8), %s406_s21, 256, %s408_s23, %s415_s25, %s347_s12, %s347_s12, %s348_s13  }
  0x25   : > { %p103_p11 = scmp.lt.s32.totalorder %s344_s9, 9  ;;  %p467_p13 = scmp.ge.s32.totalorder %s344_s9, 1 }
  0x27   : > { %p104_p0 = pnand %p467_p13, %p103_p11 }
  0x28   : > { %s109_s16 = sand.u32 (!%p104_p0), 1, %s336_s7   ;;  %p468_p7 = scmp.ne.s32.totalorder (!%p104_p0), %s465_s15, 0 }
  0x29   : > { %107 = sbr.rel (%p104_p0) target bundleno = 169 (0xa9), region = 24  ;;  %s233_s17 = sshll.u32 (!%p104_p0), %s109_s16, 4 }
  0x2a   : > { %s110_s18 = scalar_lea.sflag (!%p104_p0), [#allocation3], %s109_s16  ;;  %s113_s19 = scalar_lea.vmem (!%p104_p0), [#allocation2], %s233_s17 }
  0x2e   : > { %327 = dma.done.wait (%p468_p7), %s110_s18, 256  }
  0x2f   : > { %329 = vsyncadd (%p468_p7), %s110_s18, 4294967040  ;;  %p132_p9 = scmp.lt.s32.totalorder %s380_s10, 7  ;;  %vm137_vm0 = vcmask 156672   ;;  %vm140_vm1 = vcmask 15360   ;;  %vm143_vm2 = vcmask 162960   ;;  %v146_v0 = vld [vmem:[%s113_s19] sm:$0xff] }
  0x30   : > { %v349_v1 = vmov 0.0   ;;  %s350_s15 = smov 2   ;;  %v147_v2 = vld [vmem:[%s113_s19 + $0x8] sm:$0xff]  ;;  %vm156_vm3 = vcmask 146448  }
  0x31   : > { %s474_s10 = smov (!%p132_p9, %s380_s10), 7  ;;  %150 = vrot.lane.b32.xlu0 %v146_v0, %s350_s15 }
  0x32   : > { %s238_s20 = smul.u32 24, %s474_s10 }
  0x34   : > { %s136_s22 = scalar_lea.vmem %s463_s1, %s238_s20 }
  0x35   : > { %138 = vst.msk [vmem:[%s136_s22] sm:$0x3] %vm137_vm0, %v349_v1  ;;  %139 = vst.msk [vmem:[%s136_s22 + $0x12] sm:$0x3] %vm137_vm0, %v349_v1  ;;  %152 = vrot.lane.b32.xlu0 %v147_v2, %s350_s15 }
  0x36   : > { %141 = vst.msk [vmem:[%s136_s22 + $0x2] sm:$0xff] %vm140_vm1, %v349_v1  ;;  %142 = vst.msk [vmem:[%s136_s22 + $0xa] sm:$0xff] %vm140_vm1, %v349_v1 }
  0x37   : > { %144 = vst.msk [vmem:[%s136_s22 + $0x2] sm:$0xff] %vm143_vm2, %v349_v1  ;;  %145 = vst.msk [vmem:[%s136_s22 + $0xa] sm:$0xff] %vm143_vm2, %v349_v1 }
  0xa3   : > { %v151_v3 = vpop.permute.xlu0 %150 }
  0xa4   : > { %157 = vst.msk [vmem:[%s136_s22 + $0x2] sm:$0xff] %vm156_vm3, %v151_v3 }
  0xa7   : > { %v153_v4 = vpop.permute.xlu0 %152 }
  0xa8   : > { %158 = vst.msk [vmem:[%s136_s22 + $0xa] sm:$0xff] %vm156_vm3, %v153_v4 }
  0xa9 PF: > { %p11_p8 = scmp.ge.s32.totalorder %s383_s11, 10   ;;  %s469_s6 = smov %s336_s7 }
  0xaa   : > { %s470_s7 = smov %s340_s8  ;;  %s471_s8 = smov %s393_s14 }
  0xab   : > { %s472_s9 = smov %s383_s11  ;;  %13 = sbr.rel (!%p11_p8) target bundleno = 3 (0x3), region = 64 }
  0xb0   :  { %180 = vsyncpa [#allocation3], 1 }
  0xb1   :  { %182 = vsyncpa [#allocation3 + $0x1], 1 }

</bundles_post_ra>
